<compile_context>
chip_gen: v7x
topology: tpu7x:2x2x1
jax: 0.10.0
libtpu: 0.0.40
codegen_flags: <defaults>
</compile_context>

<pallas_src>
import functools

import jax
import jax.numpy as jnp
from jax import lax
from jax.experimental import pallas as pl
from jax.experimental.pallas import tpu as pltpu


def _round_up(x, m):
    return (x + m - 1) // m * m


def _physical_vmem_bytes():
    try:
        info = pltpu.get_tpu_info()
        v = getattr(info, "vmem_capacity_bytes", None)
        if v:
            return int(v)
    except Exception:
        pass
    return 64 * 1024 * 1024  # conservative default (v7x-sized)


_PHYS_VMEM = _physical_vmem_bytes()
# ~45% headroom for double-buffering + compiler scratch on every generation.
_VMEM_LIMIT = max(32 * 1024 * 1024, min(int(_PHYS_VMEM * 0.55), 100 * 1024 * 1024))
_BIG_VMEM = _PHYS_VMEM >= 100 * 1024 * 1024  # v5e / v6e (128 MiB) vs v7x (64 MiB)


def _pick_tm(m):
    """Row tile: big tiles (less weight re-fetch) but >=2 tiles so both v7x TCs work."""
    caps = (1024, 512, 256) if _BIG_VMEM else (512, 256)
    for tm in caps:
        if m >= 2 * tm:
            return tm
    return max(8, _round_up(min(m, 256), 8))


def _pick_tn(n):
    if n <= 512:
        return n  # full-dim block is always legal
    for tn in (512, 256, 128):
        if n % tn == 0:
            return tn
    return n


def _pick_th(ho, wo):
    """Output-row tile for the 3x3 conv: must divide Ho; prefer >=2 blocks."""
    best = ho
    for th in range(1, ho + 1):
        if ho % th:
            continue
        if 48 <= th * wo <= 2048 and ho // th >= 2:
            best = th
    return best


# ---------------------------------------------------------------------------
# Pallas kernels
# ---------------------------------------------------------------------------
def _matmul_bn_act_kernel(x_ref, w_ref, s_ref, b_ref, o_ref, *, relu):
    # bf16 x bf16 -> f32 accumulate on the MXU; minimal f32 epilogue.
    acc = jnp.dot(x_ref[...], w_ref[...], preferred_element_type=jnp.float32)
    y = acc * s_ref[...] + b_ref[...]
    if relu:
        y = jnp.maximum(y, 0.0)
    o_ref[...] = y.astype(o_ref.dtype)


def _dual_matmul_add_relu_kernel(y_ref, x_ref, w3_ref, ws_ref, s3_ref, ss_ref,
                                 b_ref, o_ref):
    # out = relu( (y @ w3) * s3 + (x @ ws) * ss + b )   (b = b3 + b_shortcut)
    acc = jnp.dot(y_ref[...], w3_ref[...],
                  preferred_element_type=jnp.float32) * s3_ref[...]
    acc = acc + jnp.dot(x_ref[...], ws_ref[...],
                        preferred_element_type=jnp.float32) * ss_ref[...]
    acc = acc + b_ref[...]
    o_ref[...] = jnp.maximum(acc, 0.0).astype(o_ref.dtype)


def _conv3x3_s1_kernel(x_ref, w_ref, s_ref, b_ref, o_ref):
    # x_ref: (Hp, Wp, C)  padded image, bf16, resident across the row-block axis
    # w_ref: (3, 3C, Cout) bf16;  s_ref/b_ref: (1, Cout) f32
    # o_ref: (TH, Wo, Cout) — exact output block (no junk columns)
    th, wo, cout = o_ref.shape
    c = x_ref.shape[-1]
    row0 = pl.program_id(1) * th
    rows = x_ref[pl.ds(row0, th + 2), :, :]                      # (TH+2, Wp, C)
    # kw-merged activation built once per block: [.., w, kw*C+ci] = rows[.., w+kw, ci]
    cat = jnp.concatenate([rows[:, kw:kw + wo, :] for kw in range(3)], axis=-1)
    acc = jnp.zeros((th * wo, cout), jnp.float32)
    for kh in range(3):                                          # 3 dots, K = 3C
        patch = cat[kh:kh + th].reshape(th * wo, 3 * c)          # leading-dim slice
        acc = acc + jnp.dot(patch, w_ref[kh], preferred_element_type=jnp.float32)
    y = acc * s_ref[...] + b_ref[...]
    o_ref[...] = jnp.maximum(y, 0.0).reshape(th, wo, cout).astype(o_ref.dtype)


def _conv3x3_s2_kernel(xe_ref, xo_ref, w_ref, s_ref, b_ref, o_ref):
    # xe_ref/xo_ref: (Ho+1, Wo, 3C) even / odd padded input rows, kw-merged, bf16
    # o_ref: (TH, Wo, Cout)
    th, wo, cout = o_ref.shape
    c3 = xe_ref.shape[-1]
    h0 = pl.program_id(1) * th
    taps = (xe_ref[pl.ds(h0, th), :, :],         # kh=0 -> padded input row 2h
            xo_ref[pl.ds(h0, th), :, :],         # kh=1 -> padded input row 2h+1
            xe_ref[pl.ds(h0 + 1, th), :, :])     # kh=2 -> padded input row 2h+2
    acc = jnp.zeros((th * wo, cout), jnp.float32)
    for kh in range(3):                                          # 3 dots, K = 3C
        acc = acc + jnp.dot(taps[kh].reshape(th * wo, c3), w_ref[kh],
                            preferred_element_type=jnp.float32)
    y = acc * s_ref[...] + b_ref[...]
    o_ref[...] = jnp.maximum(y, 0.0).reshape(th, wo, cout).astype(o_ref.dtype)


# ---------------------------------------------------------------------------
# Kernel wrappers
# ---------------------------------------------------------------------------
def matmul_bn_act(x2d, w, scale, bias, *, relu, out_dtype=jnp.bfloat16):
    """y = relu?( (x2d @ w) * scale + bias ); bf16 operands, f32 accumulate."""
    M, K = x2d.shape
    K2, N = w.shape
    assert K == K2
    tm, tn = _pick_tm(M), _pick_tn(N)
    return pl.pallas_call(
        functools.partial(_matmul_bn_act_kernel, relu=relu),
        out_shape=jax.ShapeDtypeStruct((M, N), out_dtype),
        grid_spec=pltpu.PrefetchScalarGridSpec(
            num_scalar_prefetch=0,
            grid=(pl.cdiv(M, tm), pl.cdiv(N, tn)),
            in_specs=[
                pl.BlockSpec((tm, K), lambda i, j: (i, 0)),
                pl.BlockSpec((K, tn), lambda i, j: (0, j)),
                pl.BlockSpec((1, tn), lambda i, j: (0, j)),
                pl.BlockSpec((1, tn), lambda i, j: (0, j)),
            ],
            out_specs=pl.BlockSpec((tm, tn), lambda i, j: (i, j)),
        ),
        compiler_params=pltpu.CompilerParams(
            dimension_semantics=("parallel", "parallel"),
            vmem_limit_bytes=_VMEM_LIMIT,
        ),
    )(x2d.astype(jnp.bfloat16), w.astype(jnp.bfloat16),
      scale.reshape(1, N).astype(jnp.float32),
      bias.reshape(1, N).astype(jnp.float32))


def dual_matmul_add_relu(y2d, x2d, w3, ws, s3, ss, bsum):
    """out = relu( (y2d@w3)*s3 + (x2d@ws)*ss + bsum ) — fused conv3 + shortcut."""
    M, C = y2d.shape
    Mx, Cin = x2d.shape
    assert M == Mx
    C4 = w3.shape[1]
    assert ws.shape == (Cin, C4)
    tm, tn = _pick_tm(M), _pick_tn(C4)
    return pl.pallas_call(
        _dual_matmul_add_relu_kernel,
        out_shape=jax.ShapeDtypeStruct((M, C4), jnp.bfloat16),
        grid_spec=pltpu.PrefetchScalarGridSpec(
            num_scalar_prefetch=0,
            grid=(pl.cdiv(M, tm), pl.cdiv(C4, tn)),
            in_specs=[
                pl.BlockSpec((tm, C), lambda i, j: (i, 0)),
                pl.BlockSpec((tm, Cin), lambda i, j: (i, 0)),
                pl.BlockSpec((C, tn), lambda i, j: (0, j)),
                pl.BlockSpec((Cin, tn), lambda i, j: (0, j)),
                pl.BlockSpec((1, tn), lambda i, j: (0, j)),
                pl.BlockSpec((1, tn), lambda i, j: (0, j)),
                pl.BlockSpec((1, tn), lambda i, j: (0, j)),
            ],
            out_specs=pl.BlockSpec((tm, tn), lambda i, j: (i, j)),
        ),
        compiler_params=pltpu.CompilerParams(
            dimension_semantics=("parallel", "parallel"),
            vmem_limit_bytes=_VMEM_LIMIT,
        ),
    )(y2d.astype(jnp.bfloat16), x2d.astype(jnp.bfloat16),
      w3.astype(jnp.bfloat16), ws.astype(jnp.bfloat16),
      s3.reshape(1, C4).astype(jnp.float32),
      ss.reshape(1, C4).astype(jnp.float32),
      bsum.reshape(1, C4).astype(jnp.float32))


def conv3x3_bn_relu(y_nhwc, w_hwio, scale, bias, stride):
    """3x3 conv, pad=1, stride 1 or 2, fused BN + ReLU. Direct conv — no im2col."""
    N, H, W, C = y_nhwc.shape
    cout = w_hwio.shape[-1]
    Ho = (H + 2 - 3) // stride + 1
    Wo = (W + 2 - 3) // stride + 1

    w9 = w_hwio.reshape(3, 3 * C, cout).astype(jnp.bfloat16)   # [kh, kw*C+ci, co]
    s2 = scale.reshape(1, cout).astype(jnp.float32)
    b2 = bias.reshape(1, cout).astype(jnp.float32)

    th = _pick_th(Ho, Wo)
    grid = (N, Ho // th)
    w_spec = pl.BlockSpec((3, 3 * C, cout), lambda n, hb: (0, 0, 0))
    v_spec = pl.BlockSpec((1, cout), lambda n, hb: (0, 0))
    out_spec = pl.BlockSpec((None, th, Wo, cout), lambda n, hb: (n, hb, 0, 0))
    cparams = pltpu.CompilerParams(
        dimension_semantics=("parallel", "parallel"),
        vmem_limit_bytes=_VMEM_LIMIT,
    )

    # TODO(synk): fuse this spatial zero-pad into conv1's output write.
    xp = jnp.pad(y_nhwc.astype(jnp.bfloat16), ((0, 0), (1, 1), (1, 1), (0, 0)))

    if stride == 1:
        Hp, Wp = H + 2, W + 2
        return pl.pallas_call(
            _conv3x3_s1_kernel,
            out_shape=jax.ShapeDtypeStruct((N, Ho, Wo, cout), jnp.bfloat16),
            grid_spec=pltpu.PrefetchScalarGridSpec(
                num_scalar_prefetch=0, grid=grid,
                in_specs=[pl.BlockSpec((None, Hp, Wp, C), lambda n, hb: (n, 0, 0, 0)),
                          w_spec, v_spec, v_spec],
                out_specs=out_spec,
            ),
            compiler_params=cparams,
        )(xp, w9, s2, b2)

    assert stride == 2 and H % 2 == 0 and W % 2 == 0
    # Column phases kw=0/1/2 concatenated along channels (K=3C), then split into
    # even / odd padded rows so every kh tap is a contiguous leading-dim slice.
    cat = jnp.concatenate(
        [xp[:, :, kw:kw + 2 * Wo:2, :] for kw in range(3)], axis=-1)  # (N,H+2,Wo,3C)
    xe = cat[:, 0::2]   # padded rows 0,2,...,H     -> (N, Ho+1, Wo, 3C)
    xo = cat[:, 1::2]   # padded rows 1,3,...,H+1   -> (N, Ho+1, Wo, 3C)
    Hg = Ho + 1
    return pl.pallas_call(
        _conv3x3_s2_kernel,
        out_shape=jax.ShapeDtypeStruct((N, Ho, Wo, cout), jnp.bfloat16),
        grid_spec=pltpu.PrefetchScalarGridSpec(
            num_scalar_prefetch=0, grid=grid,
            in_specs=[pl.BlockSpec((None, Hg, Wo, 3 * C), lambda n, hb: (n, 0, 0, 0)),
                      pl.BlockSpec((None, Hg, Wo, 3 * C), lambda n, hb: (n, 0, 0, 0)),
                      w_spec, v_spec, v_spec],
            out_specs=out_spec,
        ),
        compiler_params=cparams,
    )(xe, xo, w9, s2, b2)


# ---------------------------------------------------------------------------
# Glue: BN folding, parameter init
# ---------------------------------------------------------------------------
def fold_bn(layer, eps=1e-5):
    """Fold conv bias + eval-mode BatchNorm into per-channel (scale, bias)."""
    scale = layer["gamma"] / jnp.sqrt(layer["var"] + eps)
    bias = layer["beta"] + (layer["cb"] - layer["mean"]) * scale
    return scale, bias


def make_layer(key, w_shape, cout):
    k = jax.random.split(key, 6)
    return dict(
        w=0.1 * jax.random.normal(k[0], w_shape, jnp.float32),
        cb=0.1 * jax.random.normal(k[1], (cout,), jnp.float32),
        gamma=1.0 + 0.1 * jax.random.normal(k[2], (cout,), jnp.float32),
        beta=0.1 * jax.random.normal(k[3], (cout,), jnp.float32),
        mean=0.1 * jax.random.normal(k[4], (cout,), jnp.float32),
        var=0.5 + jax.random.uniform(k[5], (cout,), jnp.float32),
    )


def init_params(key, channels, stride):
    cin = channels if stride == 1 else channels * 2
    c, c4 = channels, channels * 4
    k1, k2, k3, ks = jax.random.split(key, 4)
    return (
        make_layer(k1, (cin, c), c),        # body conv1: 1x1
        make_layer(k2, (3, 3, c, c), c),    # body conv2: 3x3, stride
        make_layer(k3, (c, c4), c4),        # body conv3: 1x1
        make_layer(ks, (cin, c4), c4),      # shortcut : 1x1, stride
    )


# ---------------------------------------------------------------------------
# ConvBlock forward (Pallas path)
# ---------------------------------------------------------------------------
def conv_block_forward(x_nchw, layers, stride):
    l1, l2, l3, ls = layers
    x = jnp.transpose(x_nchw, (0, 2, 3, 1)).astype(jnp.bfloat16)  # NCHW -> NHWC
    N, H, W, Cin = x.shape
    C = l1["w"].shape[1]
    C4 = l3["w"].shape[1]

    # body conv1 (1x1, s=1) + BN + ReLU
    s1, b1 = fold_bn(l1)
    y1 = matmul_bn_act(x.reshape(-1, Cin), l1["w"], s1, b1,
                       relu=True).reshape(N, H, W, C)

    # body conv2 (3x3, stride, pad=1) + BN + ReLU — direct conv, both strides
    s2, b2 = fold_bn(l2)
    y2 = conv3x3_bn_relu(y1, l2["w"], s2, b2, stride)
    _, Ho, Wo, _ = y2.shape

    # fused: body conv3 (1x1) + BN  +  shortcut conv (1x1, stride) + BN
    #        + residual add + final ReLU, single pallas_call, bf16 out.
    s3, b3 = fold_bn(l3)
    ss, bs = fold_bn(ls)
    xs = x[:, ::stride, ::stride, :]
    out = dual_matmul_add_relu(y2.reshape(-1, C), xs.reshape(-1, Cin),
                               l3["w"], ls["w"], s3, ss, b3 + bs)
    out = out.reshape(N, Ho, Wo, C4)
    # transpose on bf16; only the very last cast produces f32 (module output dtype)
    return jnp.transpose(out, (0, 3, 1, 2)).astype(jnp.float32)  # NHWC -> NCHW


# ---------------------------------------------------------------------------
# Pure-JAX reference (lax.conv, f32) for correctness checking
# ---------------------------------------------------------------------------
def reference_forward(x_nchw, layers, stride, eps=1e-5):
    l1, l2, l3, ls = layers

    def conv(x, w_hwio, b, s, pad):
        return lax.conv_general_dilated(
            x, w_hwio, (s, s), pad,
            dimension_numbers=("NHWC", "HWIO", "NHWC")) + b

    def bn(x, p):
        return (x - p["mean"]) / jnp.sqrt(p["var"] + eps) * p["gamma"] + p["beta"]

    x = jnp.transpose(x_nchw, (0, 2, 3, 1))
    y = jax.nn.relu(bn(conv(x, l1["w"].reshape(1, 1, *l1["w"].shape), l1["cb"],
                            1, [(0, 0), (0, 0)]), l1))
    y = jax.nn.relu(bn(conv(y, l2["w"], l2["cb"], stride, [(1, 1), (1, 1)]), l2))
    y = bn(conv(y, l3["w"].reshape(1, 1, *l3["w"].shape), l3["cb"],
                1, [(0, 0), (0, 0)]), l3)
    sc = bn(conv(x, ls["w"].reshape(1, 1, *ls["w"].shape), ls["cb"],
                 stride, [(0, 0), (0, 0)]), ls)
    out = jax.nn.relu(y + sc)
    return jnp.transpose(out, (0, 3, 1, 2))


if __name__ == "__main__":
    key = jax.random.PRNGKey(0)
    channels = 4
    for stride in (1, 2):                      # exercise both conv2 kernels
        cin = channels if stride == 1 else channels * 2
        kx, kp, key = jax.random.split(key, 3)
        x = jax.random.normal(kx, (2, cin, 16, 16), jnp.float32)  # NCHW like PyTorch
        layers = init_params(kp, channels, stride)

        out = jax.block_until_ready(conv_block_forward(x, layers, stride))
        ref = reference_forward(x, layers, stride)

        so = 16 // stride
        assert out.shape == ref.shape == (2, 4 * channels, so, so), (out.shape, ref.shape)
        err = float(jnp.max(jnp.abs(out - ref)))
        tol = 3e-2 * (1.0 + float(jnp.max(jnp.abs(ref))))  # bf16 operands vs f32 ref
        assert err <= tol, (stride, err, tol)

    print("KERNEL_OK")
</pallas_src>

<mosaic_0001>
module attributes {stable_mosaic.version = 11 : i64} {
  func.func @_matmul_bn_act_kernel(%arg0: i32, %arg1: i32, %arg2: memref<256x4xbf16, #tpu.memory_space<vmem>>, %arg3: memref<4x4xbf16, #tpu.memory_space<vmem>>, %arg4: memref<1x4xf32, #tpu.memory_space<vmem>>, %arg5: memref<1x4xf32, #tpu.memory_space<vmem>>, %arg6: memref<256x4xbf16, #tpu.memory_space<vmem>>) attributes {dimension_semantics = [#tpu.dimension_semantics<parallel>, #tpu.dimension_semantics<parallel>], iteration_bounds = array<i64: 2, 1>, scalar_prefetch = 0 : i64, scratch_operands = 0 : i64, tpu.core_type = #tpu.core_type<tc>, window_params = [{transform_indices = @transform_0, window_bounds = array<i64: 256, 4>}, {transform_indices = @transform_1, window_bounds = array<i64: 4, 4>}, {transform_indices = @transform_2, window_bounds = array<i64: 1, 4>}, {transform_indices = @transform_3, window_bounds = array<i64: 1, 4>}, {transform_indices = @transform_4, window_bounds = array<i64: 256, 4>}]} {
    %c0 = arith.constant 0 : index
    %c0_0 = arith.constant 0 : index
    %0 = vector.load %arg2[%c0, %c0_0] : memref<256x4xbf16, #tpu.memory_space<vmem>>, vector<256x4xbf16>
    %c0_1 = arith.constant 0 : index
    %c0_2 = arith.constant 0 : index
    %1 = vector.load %arg3[%c0_1, %c0_2] : memref<4x4xbf16, #tpu.memory_space<vmem>>, vector<4x4xbf16>
    %cst = arith.constant dense<0.000000e+00> : vector<256x4xf32>
    %2 = tpu.matmul %0, %1, %cst {dimension_numbers = #tpu.dot_dimension_numbers<[1], [0], [0], [1], [0, 0, 1, 1], [], []>} : vector<256x4xbf16>, vector<4x4xbf16>, vector<256x4xf32> -> vector<256x4xf32>
    %c0_3 = arith.constant 0 : index
    %c0_4 = arith.constant 0 : index
    %3 = vector.load %arg4[%c0_3, %c0_4] : memref<1x4xf32, #tpu.memory_space<vmem>>, vector<1x4xf32>
    %4 = vector.broadcast %3 : vector<1x4xf32> to vector<256x4xf32>
    %5 = arith.mulf %2, %4 : vector<256x4xf32>
    %c0_5 = arith.constant 0 : index
    %c0_6 = arith.constant 0 : index
    %6 = vector.load %arg5[%c0_5, %c0_6] : memref<1x4xf32, #tpu.memory_space<vmem>>, vector<1x4xf32>
    %7 = vector.broadcast %6 : vector<1x4xf32> to vector<256x4xf32>
    %8 = arith.addf %5, %7 : vector<256x4xf32>
    %cst_7 = arith.constant 0.000000e+00 : f32
    %9 = vector.broadcast %cst_7 : f32 to vector<256x4xf32>
    %10 = arith.maximumf %8, %9 : vector<256x4xf32>
    %11 = arith.truncf %10 : vector<256x4xf32> to vector<256x4xbf16>
    %c0_8 = arith.constant 0 : index
    %c0_9 = arith.constant 0 : index
    %12 = vector.load %arg6[%c0_8, %c0_9] : memref<256x4xbf16, #tpu.memory_space<vmem>>, vector<256x4xbf16>
    tpu.vector_store %arg6[%c0_8, %c0_9], %11 {strides = array<i32>} : memref<256x4xbf16, #tpu.memory_space<vmem>>, vector<256x4xbf16>,
    return
  }
  func.func @transform_0(%arg0: i32, %arg1: i32) -> (i32, i32) {
    %c0_i32 = arith.constant 0 : i32
    %c0_i32_0 = arith.constant 0 : i32
    return %arg0, %c0_i32 : i32, i32
  }
  func.func @transform_1(%arg0: i32, %arg1: i32) -> (i32, i32) {
    %c0_i32 = arith.constant 0 : i32
    %c0_i32_0 = arith.constant 0 : i32
    return %c0_i32, %arg1 : i32, i32
  }
  func.func @transform_2(%arg0: i32, %arg1: i32) -> (i32, i32) {
    %c0_i32 = arith.constant 0 : i32
    %c0_i32_0 = arith.constant 0 : i32
    return %c0_i32, %arg1 : i32, i32
  }
  func.func @transform_3(%arg0: i32, %arg1: i32) -> (i32, i32) {
    %c0_i32 = arith.constant 0 : i32
    %c0_i32_0 = arith.constant 0 : i32
    return %c0_i32, %arg1 : i32, i32
  }
  func.func @transform_4(%arg0: i32, %arg1: i32) -> (i32, i32) {
    %c0_i32 = arith.constant 0 : i32
    return %arg0, %arg1 : i32, i32
  }
}

</mosaic_0001>

<bundles_post_ra>
// kernel: tpu_custom_call.1
= control target key start
LH: loop header
LB: loop body
LE: loop exit
PB: predicated region body
PF: predicated region fallthrough
CT: control target
= control target key end

     0   :  { %s1235_s15 = smov 0   ;;  %s1237_s16 = smov 0   ;;  %s1452_s0 = inlined_call_operand.vmem [shape: bf16[512,4], index: 0, kind: input, shape index: {}]   ;;  %s1453_s1 = inlined_call_operand.vmem [shape: bf16[4,4], index: 1, kind: input, shape index: {}]   ;;  %s1454_s2 = inlined_call_operand.vmem [shape: f32[1,4], index: 2, kind: input, shape index: {}]   ;;  %s1455_s3 = inlined_call_operand.vmem [shape: f32[1,4], index: 3, kind: input, shape index: {}]   ;;  %s1456_s4 = inlined_call_operand.vmem [shape: bf16[512,4], index: 4, kind: output, shape index: {}]  }
   0x1   :  { %s1239_s17 = smov 0  }
   0x2 LB: > { %s26_s18 = sadd.s32 1, %s1204_s16  ;;  %p986_p0 = scmp.ge.s32.totalorder %s1208_s17, 1  ;;  %s1208_s17 = sphi %s1239_s17, %s14_s17   ;;  %s1204_s16 = sphi %s1237_s16, %s1458_s16   ;;  %s1200_s15 = sphi %s1235_s15, %s1457_s15  }
   0x3   : > { %p28_p1 = scmp.ge.s32.totalorder %s26_s18, 2  ;;  %p202_p2 = scmp.lt.s32.totalorder %s1208_s17, 3 }
   0x5   : > { %s1460_s18 = smov (%p28_p1, %s26_s18), 0  ;;  %p203_p3 = pnand %p986_p0, %p202_p2 }
   0x6   : > { %v299_v0 = vld [vmem:[%s1453_s1] sm:$0x3] (!%p203_p3)  ;;  %vm429_vm0 = vcmask (!%p203_p3), 1041408   ;;  %s987_s21 = sshll.u32 (!%p203_p3), %s1200_s15, 5  ;;  %vm380_vm1 = vcmask (!%p203_p3), 31744   ;;  %vm832_vm2 = vcmask (!%p203_p3), 27648  }
   0x7   : > { %206 = sbr.rel (%p203_p3) target bundleno = 270 (0x10e), region = 36  ;;  %1144 = vmatprep.subr.msk.bf16.mxu0 (!%p203_p3), %vm429_vm0, %v299_v0  ;;  %1145 = vmatprep.subr.msk.bf16.mxu1 (!%p203_p3), %vm429_vm0, %v299_v0  ;;  %v431_v1 = vsel (!%p203_p3), %vm429_vm0, %v299_v0, 0  ;;  %p242_p4 = scmp.lt.s32.totalorder (!%p203_p3), %s987_s21, 63  ;;  %v1301_v18 = vld [vmem:[%s1454_s2] ss:$0 sm:$0xff] (!%p203_p3) }
   0x8   : > { %1109 = vmatpush3.bf16.msra.mxu0 (!%p203_p3), %v431_v1  ;;  %1143 = vmatpush3.bf16.msra.mxu1 (!%p203_p3), %v431_v1  ;;  %v1306_v20 = vld [vmem:[%s1455_s3] ss:$0 sm:$0xff] (!%p203_p3) }
   0xe   : > { %s1462_s21 = smov (!%p242_p4, %s987_s21), 63 }
   0xf   : > { %s988_s22 = sshll.u32 %s1462_s21, 2 }
  0x10   : > { %s1264_s25 = scalar_lea.vmem %s1452_s0, %s988_s22  ;;  %s1326_s6 = scalar_lea.vmem %s1456_s4, %s988_s22 }
  0x11   : > { %v1170_v2 = vld [vmem:[%s1264_s25] sm:$0xff]   ;;  %v1172_v4 = vld [vmem:[%s1264_s25 + $0x8] sm:$0xff]   ;;  %v1174_v6 = vld [vmem:[%s1264_s25 + $0x10] sm:$0xff]  }
  0x12   : > { %v1171_v3 = vld [vmem:[%s1264_s25 + $0x40] sm:$0xff]   ;;  %1110 = vmatprep.mubr.msk.bf16.mxu0 %vm380_vm1, %v1170_v2  ;;  %v1173_v5 = vld [vmem:[%s1264_s25 + $0x48] sm:$0xff]   ;;  %v1175_v7 = vld [vmem:[%s1264_s25 + $0x50] sm:$0xff]  }
  0x13   : > { %1126 = vmatprep.mubr.msk.bf16.mxu1 %vm380_vm1, %v1171_v3  ;;  %1111 = vmatmul.mubr.msk.bf16.vlgmr.msra.gmra.mrb[0].mxu0 %vm380_vm1, %v1172_v4  ;;  %v1176_v8 = vld [vmem:[%s1264_s25 + $0x18] sm:$0xff]   ;;  %v1178_v10 = vld [vmem:[%s1264_s25 + $0x20] sm:$0xff]   ;;  %v1180_v12 = vld [vmem:[%s1264_s25 + $0x28] sm:$0xff]  }
  0x14   : > { %1127 = vmatmul.mubr.msk.bf16.vlgmr.msra.gmra.mrb[0].mxu1 %vm380_vm1, %v1173_v5  ;;  %1114 = vmatprep.mubr.msk.bf16.mxu0 %vm380_vm1, %v1174_v6  ;;  %v1177_v9 = vld [vmem:[%s1264_s25 + $0x58] sm:$0xff]   ;;  %v1179_v11 = vld [vmem:[%s1264_s25 + $0x60] sm:$0xff]   ;;  %v1181_v13 = vld [vmem:[%s1264_s25 + $0x68] sm:$0xff]  }
  0x15   : > { %1130 = vmatprep.mubr.msk.bf16.mxu1 %vm380_vm1, %v1175_v7  ;;  %v1182_v14 = vld [vmem:[%s1264_s25 + $0x30] sm:$0xff]   ;;  %v1184_v16 = vld [vmem:[%s1264_s25 + $0x38] sm:$0xff]  }
  0x16   : > { %v1183_v15 = vld [vmem:[%s1264_s25 + $0x70] sm:$0xff]   ;;  %v1185_v17 = vld [vmem:[%s1264_s25 + $0x78] sm:$0xff]  }
  0x1b   : > { %1115 = vmatmul.mubr.msk.bf16.gmra.mrb[4].mxu0 %vm380_vm1, %v1176_v8 }
  0x1c   : > { %1131 = vmatmul.mubr.msk.bf16.gmra.mrb[4].mxu1 %vm380_vm1, %v1177_v9  ;;  %1118 = vmatprep.mubr.msk.bf16.mxu0 %vm380_vm1, %v1178_v10 }
  0x1d   : > { %1134 = vmatprep.mubr.msk.bf16.mxu1 %vm380_vm1, %v1179_v11 }
  0x23   : > { %1119 = vmatmul.mubr.msk.bf16.gmra.mrb[8].mxu0 %vm380_vm1, %v1180_v12 }
  0x24   : > { %1135 = vmatmul.mubr.msk.bf16.gmra.mrb[8].mxu1 %vm380_vm1, %v1181_v13  ;;  %1122 = vmatprep.mubr.msk.bf16.mxu0 %vm380_vm1, %v1182_v14 }
  0x25   : > { %1138 = vmatprep.mubr.msk.bf16.mxu1 %vm380_vm1, %v1183_v15 }
  0x2b   : > { %1123 = vmatmul.mubr.msk.bf16.gmra.mrb[12].mxu0 %vm380_vm1, %v1184_v16 }
  0x2c   : > { %1139 = vmatmul.mubr.msk.bf16.gmra.mrb[12].mxu1 %vm380_vm1, %v1185_v17 }
  0xe6   : > { %v1112_v19 = vpop.f32.mrb[0].mxu0 }
  0xe7   : > { %v603_v21 = vmul.f32 %v1112_v19, %v1301_v18  ;;  %v1128_v22 = vpop.f32.mrb[0].mxu1  ;;  %v467_v23 = vpop.f32.mrb[1].mxu0 }
  0xe8   : > { %v619_v24 = vmul.f32 %v1128_v22, %v1301_v18  ;;  %v601_v25 = vmul.f32 %v1301_v18, %v467_v23  ;;  %v531_v26 = vpop.f32.mrb[1].mxu1  ;;  %v1113_v27 = vpop.f32.mrb[2].mxu0 }
  0xe9   : > { %v642_v28 = vadd.f32 %v1306_v20, %v603_v21  ;;  %v617_v29 = vmul.f32 %v1301_v18, %v531_v26  ;;  %v604_v30 = vmul.f32 %v1113_v27, %v1301_v18  ;;  %v1129_v31 = vpop.f32.mrb[2].mxu1  ;;  %v470_v32 = vpop.f32.mrb[3].mxu0 }
  0xea   : > { %v658_v33 = vadd.f32 %v1306_v20, %v619_v24  ;;  %v640_v34 = vadd.f32 %v1306_v20, %v601_v25  ;;  %v620_v35 = vmul.f32 %v1129_v31, %v1301_v18  ;;  %v602_v36 = vmul.f32 %v1301_v18, %v470_v32  ;;  %v534_v37 = vpop.f32.mrb[3].mxu1 }
  0xeb   : > { %v674_v38 = vmax.f32 %v642_v28, 0.0  ;;  %v656_v39 = vadd.f32 %v1306_v20, %v617_v29  ;;  %v643_v40 = vadd.f32 %v1306_v20, %v604_v30  ;;  %v618_v41 = vmul.f32 %v1301_v18, %v534_v37 }
  0xec   : > { %v690_v42 = vmax.f32 %v658_v33, 0.0  ;;  %v672_v43 = vmax.f32 %v640_v34, 0.0  ;;  %v659_v44 = vadd.f32 %v1306_v20, %v620_v35  ;;  %v641_v45 = vadd.f32 %v1306_v20, %v602_v36 }
  0xed   : > { %v1061_v46 = vpack.c.bf16 %v674_v38, %v674_v38  ;;  %v688_v47 = vmax.f32 %v656_v39, 0.0  ;;  %v675_v48 = vmax.f32 %v643_v40, 0.0  ;;  %v657_v49 = vadd.f32 %v1306_v20, %v618_v41 }
  0xee   : > { %v1077_v50 = vpack.c.bf16 %v690_v42, %v690_v42  ;;  %v1059_v51 = vpack.c.bf16 %v672_v43, %v672_v43  ;;  %v691_v52 = vmax.f32 %v659_v44, 0.0  ;;  %v673_v53 = vmax.f32 %v641_v45, 0.0  ;;  %v1116_v54 = vpop.f32.mrb[4].mxu0 }
  0xef   : > { %835 = vst.msk [vmem:[%s1326_s6 + $0x8] sm:$0xf] %vm832_vm2, %v1061_v46  ;;  %v1075_v55 = vpack.c.bf16 %v688_v47, %v688_v47  ;;  %v1062_v56 = vpack.c.bf16 %v675_v48, %v675_v48  ;;  %v689_v57 = vmax.f32 %v657_v49, 0.0  ;;  %v607_v58 = vmul.f32 %v1116_v54, %v1301_v18  ;;  %v1132_v59 = vpop.f32.mrb[4].mxu1  ;;  %v483_v60 = vpop.f32.mrb[5].mxu0 }
  0xf0   : > { %851 = vst.msk [vmem:[%s1326_s6 + $0x48] sm:$0xf] %vm832_vm2, %v1077_v50  ;;  %833 = vst.msk [vmem:[%s1326_s6] sm:$0xf] %vm832_vm2, %v1059_v51  ;;  %v1078_v61 = vpack.c.bf16 %v691_v52, %v691_v52  ;;  %v1060_v62 = vpack.c.bf16 %v673_v53, %v673_v53  ;;  %v623_v63 = vmul.f32 %v1132_v59, %v1301_v18  ;;  %v547_v1 = vpop.f32.mrb[5].mxu1  ;;  %v1117_v2 = vpop.f32.mrb[6].mxu0 }
  0xf1   : > { %v605_v0 = vmul.f32 %v1301_v18, %v483_v60  ;;  %849 = vst.msk [vmem:[%s1326_s6 + $0x40] sm:$0xf] %vm832_vm2, %v1075_v55  ;;  %836 = vst.msk [vmem:[%s1326_s6 + $0xc] sm:$0xf] %vm832_vm2, %v1062_v56  ;;  %v1076_v3 = vpack.c.bf16 %v689_v57, %v689_v57  ;;  %v646_v4 = vadd.f32 %v1306_v20, %v607_v58  ;;  %v1133_v7 = vpop.f32.mrb[6].mxu1  ;;  %v486_v8 = vpop.f32.mrb[7].mxu0 }
  0xf2   : > { %v621_v5 = vmul.f32 %v1301_v18, %v547_v1  ;;  %v608_v6 = vmul.f32 %v1117_v2, %v1301_v18  ;;  %852 = vst.msk [vmem:[%s1326_s6 + $0x4c] sm:$0xf] %vm832_vm2, %v1078_v61  ;;  %834 = vst.msk [vmem:[%s1326_s6 + $0x4] sm:$0xf] %vm832_vm2, %v1060_v62  ;;  %v662_v9 = vadd.f32 %v1306_v20, %v623_v63  ;;  %v550_v13 = vpop.f32.mrb[7].mxu1 }
  0xf3   : > { %v644_v10 = vadd.f32 %v1306_v20, %v605_v0  ;;  %v624_v11 = vmul.f32 %v1133_v7, %v1301_v18  ;;  %v606_v12 = vmul.f32 %v1301_v18, %v486_v8  ;;  %850 = vst.msk [vmem:[%s1326_s6 + $0x44] sm:$0xf] %vm832_vm2, %v1076_v3  ;;  %v678_v14 = vmax.f32 %v646_v4, 0.0 }
  0xf4   : > { %v660_v15 = vadd.f32 %v1306_v20, %v621_v5  ;;  %v647_v16 = vadd.f32 %v1306_v20, %v608_v6  ;;  %v622_v17 = vmul.f32 %v1301_v18, %v550_v13  ;;  %v694_v19 = vmax.f32 %v662_v9, 0.0 }
  0xf5   : > { %v676_v21 = vmax.f32 %v644_v10, 0.0  ;;  %v663_v22 = vadd.f32 %v1306_v20, %v624_v11  ;;  %v645_v23 = vadd.f32 %v1306_v20, %v606_v12  ;;  %v1065_v24 = vpack.c.bf16 %v678_v14, %v678_v14 }
  0xf6   : > { %v692_v25 = vmax.f32 %v660_v15, 0.0  ;;  %v679_v26 = vmax.f32 %v647_v16, 0.0  ;;  %v661_v27 = vadd.f32 %v1306_v20, %v622_v17  ;;  %v1081_v28 = vpack.c.bf16 %v694_v19, %v694_v19  ;;  %v1120_v32 = vpop.f32.mrb[8].mxu0 }
  0xf7   : > { %v1063_v29 = vpack.c.bf16 %v676_v21, %v676_v21  ;;  %v695_v30 = vmax.f32 %v663_v22, 0.0  ;;  %v677_v31 = vmax.f32 %v645_v23, 0.0  ;;  %839 = vst.msk [vmem:[%s1326_s6 + $0x18] sm:$0xf] %vm832_vm2, %v1065_v24  ;;  %v611_v36 = vmul.f32 %v1120_v32, %v1301_v18  ;;  %v1136_v37 = vpop.f32.mrb[8].mxu1  ;;  %v499_v38 = vpop.f32.mrb[9].mxu0 }
  0xf8   : > { %v1079_v33 = vpack.c.bf16 %v692_v25, %v692_v25  ;;  %v1066_v34 = vpack.c.bf16 %v679_v26, %v679_v26  ;;  %v693_v35 = vmax.f32 %v661_v27, 0.0  ;;  %855 = vst.msk [vmem:[%s1326_s6 + $0x58] sm:$0xf] %vm832_vm2, %v1081_v28  ;;  %v627_v41 = vmul.f32 %v1136_v37, %v1301_v18  ;;  %v563_v43 = vpop.f32.mrb[9].mxu1  ;;  %v1121_v44 = vpop.f32.mrb[10].mxu0 }
  0xf9   : > { %837 = vst.msk [vmem:[%s1326_s6 + $0x10] sm:$0xf] %vm832_vm2, %v1063_v29  ;;  %v1082_v39 = vpack.c.bf16 %v695_v30, %v695_v30  ;;  %v1064_v40 = vpack.c.bf16 %v677_v31, %v677_v31  ;;  %v609_v42 = vmul.f32 %v1301_v18, %v499_v38  ;;  %v650_v46 = vadd.f32 %v1306_v20, %v611_v36  ;;  %v1137_v49 = vpop.f32.mrb[10].mxu1  ;;  %v502_v50 = vpop.f32.mrb[11].mxu0 }
  0xfa   : > { %853 = vst.msk [vmem:[%s1326_s6 + $0x50] sm:$0xf] %vm832_vm2, %v1079_v33  ;;  %840 = vst.msk [vmem:[%s1326_s6 + $0x1c] sm:$0xf] %vm832_vm2, %v1066_v34  ;;  %v1080_v45 = vpack.c.bf16 %v693_v35, %v693_v35  ;;  %v625_v47 = vmul.f32 %v1301_v18, %v563_v43  ;;  %v612_v48 = vmul.f32 %v1121_v44, %v1301_v18  ;;  %v566_v55 = vpop.f32.mrb[11].mxu1 }
  0xfb   : > { %856 = vst.msk [vmem:[%s1326_s6 + $0x5c] sm:$0xf] %vm832_vm2, %v1082_v39  ;;  %838 = vst.msk [vmem:[%s1326_s6 + $0x14] sm:$0xf] %vm832_vm2, %v1064_v40  ;;  %v666_v51 = vadd.f32 %v1306_v20, %v627_v41  ;;  %v648_v52 = vadd.f32 %v1306_v20, %v609_v42  ;;  %v628_v53 = vmul.f32 %v1137_v49, %v1301_v18  ;;  %v682_v56 = vmax.f32 %v650_v46, 0.0 }
  0xfc   : > { %v610_v54 = vmul.f32 %v1301_v18, %v502_v50  ;;  %854 = vst.msk [vmem:[%s1326_s6 + $0x54] sm:$0xf] %vm832_vm2, %v1080_v45  ;;  %v664_v57 = vadd.f32 %v1306_v20, %v625_v47  ;;  %v651_v58 = vadd.f32 %v1306_v20, %v612_v48  ;;  %v626_v59 = vmul.f32 %v1301_v18, %v566_v55 }
  0xfd   : > { %v698_v60 = vmax.f32 %v666_v51, 0.0  ;;  %v680_v61 = vmax.f32 %v648_v52, 0.0  ;;  %v667_v62 = vadd.f32 %v1306_v20, %v628_v53  ;;  %v1069_v0 = vpack.c.bf16 %v682_v56, %v682_v56 }
  0xfe   : > { %v649_v63 = vadd.f32 %v1306_v20, %v610_v54  ;;  %v696_v1 = vmax.f32 %v664_v57, 0.0  ;;  %v683_v2 = vmax.f32 %v651_v58, 0.0  ;;  %v665_v3 = vadd.f32 %v1306_v20, %v626_v59  ;;  %v1124_v8 = vpop.f32.mrb[12].mxu0 }
  0xff   : > { %v1085_v4 = vpack.c.bf16 %v698_v60, %v698_v60  ;;  %v1067_v5 = vpack.c.bf16 %v680_v61, %v680_v61  ;;  %v699_v6 = vmax.f32 %v667_v62, 0.0  ;;  %843 = vst.msk [vmem:[%s1326_s6 + $0x28] sm:$0xf] %vm832_vm2, %v1069_v0  ;;  %v615_v12 = vmul.f32 %v1124_v8, %v1301_v18  ;;  %v1140_v13 = vpop.f32.mrb[12].mxu1  ;;  %v515_v14 = vpop.f32.mrb[13].mxu0 }
 0x100   : > { %v681_v7 = vmax.f32 %v649_v63, 0.0  ;;  %v1083_v9 = vpack.c.bf16 %v696_v1, %v696_v1  ;;  %v1070_v10 = vpack.c.bf16 %v683_v2, %v683_v2  ;;  %v697_v11 = vmax.f32 %v665_v3, 0.0  ;;  %v579_v21 = vpop.f32.mrb[13].mxu1  ;;  %v1125_v22 = vpop.f32.mrb[14].mxu0 }
 0x101   : > { %859 = vst.msk [vmem:[%s1326_s6 + $0x68] sm:$0xf] %vm832_vm2, %v1085_v4  ;;  %841 = vst.msk [vmem:[%s1326_s6 + $0x20] sm:$0xf] %vm832_vm2, %v1067_v5  ;;  %v1086_v15 = vpack.c.bf16 %v699_v6, %v699_v6  ;;  %v631_v17 = vmul.f32 %v1140_v13, %v1301_v18  ;;  %v613_v19 = vmul.f32 %v1301_v18, %v515_v14  ;;  %v1141_v27 = vpop.f32.mrb[14].mxu1  ;;  %v518_v28 = vpop.f32.mrb[15].mxu0 }
 0x102   : > { %v1068_v16 = vpack.c.bf16 %v681_v7, %v681_v7  ;;  %857 = vst.msk [vmem:[%s1326_s6 + $0x60] sm:$0xf] %vm832_vm2, %v1083_v9  ;;  %844 = vst.msk [vmem:[%s1326_s6 + $0x2c] sm:$0xf] %vm832_vm2, %v1070_v10  ;;  %v1084_v23 = vpack.c.bf16 %v697_v11, %v697_v11  ;;  %v654_v24 = vadd.f32 %v1306_v20, %v615_v12  ;;  %v582_v33 = vpop.f32.mrb[15].mxu1 }
 0x103   : > { %v629_v25 = vmul.f32 %v1301_v18, %v579_v21  ;;  %v616_v26 = vmul.f32 %v1125_v22, %v1301_v18  ;;  %860 = vst.msk [vmem:[%s1326_s6 + $0x6c] sm:$0xf] %vm832_vm2, %v1086_v15  ;;  %v670_v29 = vadd.f32 %v1306_v20, %v631_v17  ;;  %v652_v30 = vadd.f32 %v1306_v20, %v613_v19 }
 0x104   : > { %842 = vst.msk [vmem:[%s1326_s6 + $0x24] sm:$0xf] %vm832_vm2, %v1068_v16  ;;  %v632_v31 = vmul.f32 %v1141_v27, %v1301_v18  ;;  %v614_v32 = vmul.f32 %v1301_v18, %v518_v28  ;;  %858 = vst.msk [vmem:[%s1326_s6 + $0x64] sm:$0xf] %vm832_vm2, %v1084_v23  ;;  %v686_v34 = vmax.f32 %v654_v24, 0.0  ;;  %v630_v37 = vmul.f32 %v1301_v18, %v582_v33 }
 0x105   : > { %v668_v35 = vadd.f32 %v1306_v20, %v629_v25  ;;  %v655_v36 = vadd.f32 %v1306_v20, %v616_v26  ;;  %v702_v38 = vmax.f32 %v670_v29, 0.0  ;;  %v684_v39 = vmax.f32 %v652_v30, 0.0 }
 0x106   : > { %v671_v40 = vadd.f32 %v1306_v20, %v632_v31  ;;  %v653_v41 = vadd.f32 %v1306_v20, %v614_v32  ;;  %v1073_v42 = vpack.c.bf16 %v686_v34, %v686_v34  ;;  %v669_v45 = vadd.f32 %v1306_v20, %v630_v37 }
 0x107   : > { %v700_v43 = vmax.f32 %v668_v35, 0.0  ;;  %v687_v44 = vmax.f32 %v655_v36, 0.0  ;;  %v1089_v46 = vpack.c.bf16 %v702_v38, %v702_v38  ;;  %v1071_v47 = vpack.c.bf16 %v684_v39, %v684_v39 }
 0x108   : > { %v703_v18 = vmax.f32 %v671_v40, 0.0  ;;  %v685_v48 = vmax.f32 %v653_v41, 0.0  ;;  %847 = vst.msk [vmem:[%s1326_s6 + $0x38] sm:$0xf] %vm832_vm2, %v1073_v42  ;;  %v701_v51 = vmax.f32 %v669_v45, 0.0 }
 0x109   : > { %v1087_v49 = vpack.c.bf16 %v700_v43, %v700_v43  ;;  %v1074_v50 = vpack.c.bf16 %v687_v44, %v687_v44  ;;  %863 = vst.msk [vmem:[%s1326_s6 + $0x78] sm:$0xf] %vm832_vm2, %v1089_v46  ;;  %845 = vst.msk [vmem:[%s1326_s6 + $0x30] sm:$0xf] %vm832_vm2, %v1071_v47 }
 0x10a   : > { %v1090_v52 = vpack.c.bf16 %v703_v18, %v703_v18  ;;  %v1072_v53 = vpack.c.bf16 %v685_v48, %v685_v48  ;;  %v1088_v20 = vpack.c.bf16 %v701_v51, %v701_v51 }
 0x10b   : > { %861 = vst.msk [vmem:[%s1326_s6 + $0x70] sm:$0xf] %vm832_vm2, %v1087_v49  ;;  %848 = vst.msk [vmem:[%s1326_s6 + $0x3c] sm:$0xf] %vm832_vm2, %v1074_v50 }
 0x10c   : > { %864 = vst.msk [vmem:[%s1326_s6 + $0x7c] sm:$0xf] %vm832_vm2, %v1090_v52  ;;  %846 = vst.msk [vmem:[%s1326_s6 + $0x34] sm:$0xf] %vm832_vm2, %v1072_v53 }
 0x10d   : > { %862 = vst.msk [vmem:[%s1326_s6 + $0x74] sm:$0xf] %vm832_vm2, %v1088_v20 }
 0x10e PF: > { %s14_s17 = sadd.s32 1, %s1208_s17   ;;  %s1457_s15 = smov %s1204_s16 }
 0x10f   : > { %p11_p5 = scmp.ge.s32.totalorder %s14_s17, 4   ;;  %s1458_s16 = smov %s1460_s18 }
 0x111   :  { %13 = sbr.rel (!%p11_p5) target bundleno = 2 (0x2), region = 75 }

</bundles_post_ra>
